<compile_context>
chip_gen: v6e
topology: v6e:2x2x1
jax: 0.10.0
libtpu: 0.0.40
codegen_flags: <defaults>
</compile_context>

<pallas_src>
import math

import jax
import jax.numpy as jnp
from jax import lax
from jax.experimental import pallas as pl
from jax.experimental.pallas import tpu as pltpu


def _round_up(x, m):
    return ((x + m - 1) // m) * m


def _cdiv(a, b):
    return (a + b - 1) // b


def _pick_tile(dim, max_tile, align):
    """Aligned tile that covers `dim` with the fewest blocks and minimal padding."""
    nblocks = max(1, _cdiv(dim, max_tile))
    return min(_round_up(_cdiv(dim, nblocks), align), _round_up(dim, align))


# ----------------------------- kernels ---------------------------------------


def _linear_kernel_f32_out(x_ref, w_ref, o_ref):
    # x_ref: (tm, tk) activations
    # w_ref: (tk, tn) weight, pre-transposed to [in, out] layout (no in-kernel transpose)
    # o_ref: (tm, tn) f32 output tile, resident across the K grid axis -> accumulate in place
    @pl.when(pl.program_id(2) == 0)
    def _init():
        o_ref[...] = jnp.zeros_like(o_ref)

    o_ref[...] += jnp.dot(x_ref[...], w_ref[...], preferred_element_type=jnp.float32)


def _linear_kernel_acc(x_ref, w_ref, o_ref, acc_ref):
    # Same contraction, but with an f32 scratch accumulator for non-f32 outputs.
    k = pl.program_id(2)

    @pl.when(k == 0)
    def _init():
        acc_ref[...] = jnp.zeros_like(acc_ref)

    acc_ref[...] += jnp.dot(x_ref[...], w_ref[...], preferred_element_type=jnp.float32)

    @pl.when(k == pl.num_programs(2) - 1)
    def _finalize():
        o_ref[...] = acc_ref[...].astype(o_ref.dtype)


# --------------------------- parameter prep ----------------------------------


def prepare_linear_params(weight, *, tn_max=512, tk_max=512, compute_dtype=None):
    """One-time parameter prep: cast, transpose to [in, out], pad to tile multiples.

    Call this at parameter-setup time (not per forward) so the weight
    transpose/pad HBM round-trip is amortized over all forward passes.
    """
    out_sz, in_sz = weight.shape
    w = weight if compute_dtype is None else weight.astype(compute_dtype)

    tn = _pick_tile(out_sz, tn_max, 128)  # output lane dim >= 128 -> lane-dense stores
    tk = _pick_tile(in_sz, tk_max, 128)
    Np = _round_up(out_sz, tn)
    Kp = _round_up(in_sz, tk)

    w_t = jnp.transpose(w)  # [in, out] -- single HBM transpose, reused every forward
    if (Kp, Np) != (in_sz, out_sz):
        w_t = jnp.pad(w_t, ((0, Kp - in_sz), (0, Np - out_sz)))

    return {
        "weight": w_t,
        "in_size": in_sz,
        "out_size": out_sz,
        "tn": tn,
        "tk": tk,
        "Kp": Kp,
        "Np": Np,
        "compute_dtype": compute_dtype,
    }


# ------------------------------ forward --------------------------------------


def linear_nn_forward(x, params, *, tm_max=512, input_buffering=2):
    """Forward pass of LinearNN: y = x @ weight.T (no bias).

    x:      (batch, input_size)
    params: output of prepare_linear_params(weight) with weight in PyTorch
            nn.Linear convention [output_size, input_size].
    """
    in_sz, out_sz = params["in_size"], params["out_size"]
    tn, tk, Kp, Np = params["tn"], params["tk"], params["Kp"], params["Np"]
    w = params["weight"]

    B, in_sz_x = x.shape
    assert in_sz_x == in_sz

    out_dtype = x.dtype
    if params["compute_dtype"] is not None:
        x = x.astype(params["compute_dtype"])

    # Sublane alignment depends on dtype packing (f32: 8, bf16: 16, int8: 32).
    sub = max(
        32 // jnp.dtype(x.dtype).itemsize,
        32 // jnp.dtype(out_dtype).itemsize,
        8,
    )
    # Choose tm to cover the batch tightly (minimize zero-row MXU / DMA waste).
    tm = _pick_tile(B, tm_max, sub)
    Mp = _round_up(B, tm)

    if (Mp, Kp) != (B, in_sz):
        x = jnp.pad(x, ((0, Mp - B), (0, Kp - in_sz)))  # zeros contribute 0 to the dot

    grid = (Mp // tm, Np // tn, Kp // tk)  # K last: reduction axis innermost

    x_item = jnp.dtype(x.dtype).itemsize
    w_item = jnp.dtype(w.dtype).itemsize
    o_item = jnp.dtype(out_dtype).itemsize

    f32_out = jnp.dtype(out_dtype) == jnp.dtype(jnp.float32)
    if f32_out:
        kernel = _linear_kernel_f32_out
        scratch_shapes = []
        acc_bytes = 0
    else:
        kernel = _linear_kernel_acc
        scratch_shapes = [pltpu.VMEM((tm, tn), jnp.float32)]
        acc_bytes = tm * tn * 4

    # Optional deeper input buffering (only if profiling shows exposed DMA).
    if input_buffering > 2:
        pmode = pl.Buffered(input_buffering)
        x_spec = pl.BlockSpec((tm, tk), lambda i, j, k: (i, k), pipeline_mode=pmode)
        w_spec = pl.BlockSpec((tk, tn), lambda i, j, k: (k, j), pipeline_mode=pmode)
    else:
        x_spec = pl.BlockSpec((tm, tk), lambda i, j, k: (i, k))
        w_spec = pl.BlockSpec((tk, tn), lambda i, j, k: (k, j))

    nbuf = max(2, input_buffering)
    vmem_need = (
        nbuf * (tm * tk * x_item + tk * tn * w_item)  # pipelined input tiles
        + 2 * tm * tn * o_item                        # pipelined output tiles
        + acc_bytes
    )
    # Generous headroom, but stay within v7x's 64 MiB/TC physical VMEM.
    vmem_limit = min(max(2 * vmem_need + (4 << 20), 32 << 20), 64 << 20)

    # Truthful HBM traffic: each operand is re-fetched once per tile of the
    # other output dimension.
    bytes_accessed = (
        Mp * Kp * x_item * (Np // tn)
        + Kp * Np * w_item * (Mp // tm)
        + Mp * Np * o_item
    )

    out = pl.pallas_call(
        kernel,
        out_shape=jax.ShapeDtypeStruct((Mp, Np), out_dtype),
        grid=grid,
        in_specs=[x_spec, w_spec],
        out_specs=pl.BlockSpec((tm, tn), lambda i, j, k: (i, j)),
        scratch_shapes=scratch_shapes,
        compiler_params=pltpu.CompilerParams(
            # M/N parallel (megacore-shardable), K arbitrary (resident accumulator).
            dimension_semantics=("parallel", "parallel", "arbitrary"),
            vmem_limit_bytes=int(vmem_limit),
        ),
        cost_estimate=pl.CostEstimate(
            flops=2 * Mp * Kp * Np,
            transcendentals=0,
            bytes_accessed=int(bytes_accessed),
        ),
    )(x, w)

    if (Mp, Np) != (B, out_sz):
        out = out[:B, :out_sz]
    return out


def xavier_uniform_weight(key, out_size, in_size):
    # Matches torch.nn.init.xavier_uniform_: U(-a, a), a = sqrt(6 / (fan_in + fan_out))
    a = math.sqrt(6.0 / (in_size + out_size))
    return jax.random.uniform(
        key, (out_size, in_size), dtype=jnp.float32, minval=-a, maxval=a
    )


if __name__ == "__main__":
    key = jax.random.PRNGKey(0)
    k_x, k_w, k_x2, k_w2 = jax.random.split(key, 4)

    # --- Small shapes (module-level demo, f32, exact PyTorch parity) ---
    batch, input_size, output_size = 8, 32, 16
    x = jax.random.normal(k_x, (batch, input_size), dtype=jnp.float32)
    weight = xavier_uniform_weight(k_w, output_size, input_size)

    params = prepare_linear_params(weight)
    y = jax.block_until_ready(linear_nn_forward(x, params))
    y_ref = jnp.dot(x, weight.T, precision=lax.Precision.HIGHEST)
    assert y.shape == (batch, output_size)
    assert jnp.allclose(y, y_ref, atol=1e-4, rtol=1e-4)

    # --- Multi-tile shapes: exercises the (M, N, K) grid, resident-output
    #     accumulation across K, and tight-M tiling (tm=304 for B=300) ---
    B2, in2, out2 = 300, 1000, 272
    x2 = jax.random.normal(k_x2, (B2, in2), dtype=jnp.float32)
    w2 = xavier_uniform_weight(k_w2, out2, in2)

    params2 = prepare_linear_params(w2)
    y2 = jax.block_until_ready(linear_nn_forward(x2, params2))
    y2_ref = jnp.dot(x2, w2.T, precision=lax.Precision.HIGHEST)
    assert y2.shape == (B2, out2)
    assert jnp.allclose(y2, y2_ref, atol=2e-4, rtol=2e-4)

    # --- bf16 activations + weights: exercises the f32-scratch accumulator path ---
    x3 = x.astype(jnp.bfloat16)
    params3 = prepare_linear_params(weight, compute_dtype=jnp.bfloat16)
    y3 = jax.block_until_ready(linear_nn_forward(x3, params3))
    y3_ref = jnp.dot(
        x3.astype(jnp.float32),
        weight.astype(jnp.bfloat16).astype(jnp.float32).T,
        precision=lax.Precision.HIGHEST,
    ).astype(jnp.bfloat16)
    assert y3.shape == (batch, output_size)
    assert jnp.allclose(
        y3.astype(jnp.float32), y3_ref.astype(jnp.float32), atol=5e-2, rtol=5e-2
    )

    print("KERNEL_OK")
</pallas_src>

<mosaic_0001>
module attributes {stable_mosaic.version = 11 : i64} {
  func.func @_linear_kernel_f32_out(%arg0: i32, %arg1: i32, %arg2: i32, %arg3: memref<8x128xf32, #tpu.memory_space<vmem>>, %arg4: memref<128x128xf32, #tpu.memory_space<vmem>>, %arg5: memref<8x128xf32, #tpu.memory_space<vmem>>) attributes {dimension_semantics = [#tpu.dimension_semantics<parallel>, #tpu.dimension_semantics<parallel>, #tpu.dimension_semantics<arbitrary>], iteration_bounds = array<i64: 1, 1, 1>, scalar_prefetch = 0 : i64, scratch_operands = 0 : i64, tpu.core_type = #tpu.core_type<tc>, window_params = [{transform_indices = @transform_0, window_bounds = array<i64: 8, 128>}, {transform_indices = @transform_1, window_bounds = array<i64: 128, 128>}, {transform_indices = @transform_2, window_bounds = array<i64: 8, 128>}]} {
    %c0_i32 = arith.constant 0 : i32
    %0 = arith.cmpi eq, %arg2, %c0_i32 : i32
    %1 = arith.extui %0 : i1 to i32
    %c0_i32_0 = arith.constant 0 : i32
    %2 = arith.cmpi ne, %1, %c0_i32_0 : i32
    scf.if %2 {
      %cst_8 = arith.constant 0.000000e+00 : f32
      %9 = vector.broadcast %cst_8 : f32 to vector<8x128xf32>
      %c0_9 = arith.constant 0 : index
      %c0_10 = arith.constant 0 : index
      %10 = vector.load %arg5[%c0_9, %c0_10] : memref<8x128xf32, #tpu.memory_space<vmem>>, vector<8x128xf32>
      tpu.vector_store %arg5[%c0_9, %c0_10], %9 {strides = array<i32>} : memref<8x128xf32, #tpu.memory_space<vmem>>, vector<8x128xf32>,
    } else {
    }
    %c0 = arith.constant 0 : index
    %c0_1 = arith.constant 0 : index
    %3 = vector.load %arg5[%c0, %c0_1] : memref<8x128xf32, #tpu.memory_space<vmem>>, vector<8x128xf32>
    %c0_2 = arith.constant 0 : index
    %c0_3 = arith.constant 0 : index
    %4 = vector.load %arg3[%c0_2, %c0_3] : memref<8x128xf32, #tpu.memory_space<vmem>>, vector<8x128xf32>
    %c0_4 = arith.constant 0 : index
    %c0_5 = arith.constant 0 : index
    %5 = vector.load %arg4[%c0_4, %c0_5] : memref<128x128xf32, #tpu.memory_space<vmem>>, vector<128x128xf32>
    %cst = arith.constant dense<0.000000e+00> : vector<8x128xf32>
    %6 = tpu.matmul %4, %5, %cst {dimension_numbers = #tpu.dot_dimension_numbers<[1], [0], [0], [1], [0, 0, 1, 1], [], []>} : vector<8x128xf32>, vector<128x128xf32>, vector<8x128xf32> -> vector<8x128xf32>
    %7 = arith.addf %3, %6 : vector<8x128xf32>
    %c0_6 = arith.constant 0 : index
    %c0_7 = arith.constant 0 : index
    %8 = vector.load %arg5[%c0_6, %c0_7] : memref<8x128xf32, #tpu.memory_space<vmem>>, vector<8x128xf32>
    tpu.vector_store %arg5[%c0_6, %c0_7], %7 {strides = array<i32>} : memref<8x128xf32, #tpu.memory_space<vmem>>, vector<8x128xf32>,
    return
  }
  func.func @transform_0(%arg0: i32, %arg1: i32, %arg2: i32) -> (i32, i32) {
    %c0_i32 = arith.constant 0 : i32
    return %arg0, %arg2 : i32, i32
  }
  func.func @transform_1(%arg0: i32, %arg1: i32, %arg2: i32) -> (i32, i32) {
    %c0_i32 = arith.constant 0 : i32
    return %arg2, %arg1 : i32, i32
  }
  func.func @transform_2(%arg0: i32, %arg1: i32, %arg2: i32) -> (i32, i32) {
    %c0_i32 = arith.constant 0 : i32
    return %arg0, %arg1 : i32, i32
  }
}

</mosaic_0001>

<bundles_post_ra>
// kernel: tpu_custom_call.1
= control target key start
LH: loop header
LB: loop body
LE: loop exit
PB: predicated region body
PF: predicated region fallthrough
CT: control target
= control target key end

     0   :  { %7 = vsyncpa [#allocation3], 0  ;;  %s305_s0 = inlined_call_operand.hbm [shape: f32[8,128], index: 0, kind: input, shape index: {}]   ;;  %s306_s1 = inlined_call_operand.hbm [shape: f32[128,128], index: 1, kind: input, shape index: {}]   ;;  %s307_s2 = inlined_call_operand.hbm [shape: f32[8,128], index: 2, kind: output, shape index: {}]  }
   0x1   :  { %8 = vsyncpa [#allocation6], 0 }
   0x2   :  { %9 = vsyncpa [#allocation4], 0  ;;  %s274_s9 = smov [#allocation2]   ;;  %s275_s11 = smov [#allocation5]  }
   0x3   :  { %s16_s10 = sshll.u32 %s274_s9, 4  ;;  %s25_s12 = sshll.u32 %s275_s11, 4  ;;  %s17_s10 = int_to_ptr.vmem [resolvable:$true] %s16_s10  ;;  %s26_s12 = int_to_ptr.vmem [resolvable:$true] %s25_s12 }
   0x4   :  { %s216_s13 = scalar_lea.vmem %s17_s10, 128  ;;  %p221_p1 = scmp.lt.s32.totalorder %s17_s10, %s17_s10 }
   0x5   :  { %p217_p0 = scmp.ne.s32.totalorder %s17_s10, %s216_s13  ;;  %p222_p2 = scmp.lt.s32.totalorder %s216_s13, %s216_s13 }
   0x7   :  { %p223_p3 = por %p222_p2, %p221_p1 }
   0x9   :  { %p224_p4 = pnand %p223_p3, %p217_p0 }
   0xb   :  { %227 = shalt.err (!%p224_p4)
}
   0xc   :  { %19 = dma.hbm_to_vmem [thread:$0]  %s305_s0, 128, %s17_s10, [#allocation3]  }
   0xd   :  { %s236_s16 = scalar_lea.vmem %s26_s12, 2048  ;;  %p241_p6 = scmp.lt.s32.totalorder %s26_s12, %s26_s12 }
   0xe   :  { %p237_p5 = scmp.ne.s32.totalorder %s26_s12, %s236_s16  ;;  %p242_p7 = scmp.lt.s32.totalorder %s236_s16, %s236_s16 }
  0x10   :  { %p243_p8 = por %p242_p7, %p241_p6 }
  0x12   :  { %p244_p9 = pnand %p243_p8, %p237_p5 }
  0x14   :  { %247 = shalt.err (!%p244_p9)
}
  0x15   :  { %s276_s17 = smov 128   ;;  %s277_s18 = smov 8  }
  0x16   :  { %31 = dma.hbm_to_vmem [thread:$0]  %s306_s1, 2048, %s26_s12, [#allocation6], %s276_s17, %s276_s17, %s277_s18  }
  0x17   :  { %268 = dma.done.wait [#allocation3], 128  }
  0x18   :  { %269 = vsyncadd [#allocation3], 4294967168 }
  0x19   :  { %270 = dma.done.wait [#allocation6], 2048  }
  0x1a   :  { %271 = vsyncadd [#allocation6], 4294965248  ;;  %v278_v0 = vmov 0.0   ;;  %vm279_vm0 = vmmov 0   ;;  %v60_v1 = vld [vmem:[#allocation5 + $0x78] sm:$0xff]  ;;  %v59_v2 = vld [vmem:[#allocation5 + $0x70] sm:$0xff] }
  0x1b   :  { %166 = vmatprep.subr.mxu0 %v278_v0  ;;  %198 = vmatprep.mubr.msk.f32.mxu0 %vm279_vm0, %v278_v0  ;;  %v58_v3 = vld [vmem:[#allocation5 + $0x68] sm:$0xff]  ;;  %v57_v4 = vld [vmem:[#allocation5 + $0x60] sm:$0xff]  ;;  %v56_v5 = vld [vmem:[#allocation5 + $0x58] sm:$0xff]  ;;  %s280_s0 = smov [#allocation7]  }
  0x1c   :  { %167 = vmatpush3.msra.mxu0 %v60_v1  ;;  %v55_v6 = vld [vmem:[#allocation5 + $0x50] sm:$0xff]  ;;  %v54_v7 = vld [vmem:[#allocation5 + $0x48] sm:$0xff]  ;;  %v53_v8 = vld [vmem:[#allocation5 + $0x40] sm:$0xff]  ;;  %s139_s1 = sshll.u32 %s280_s0, 4  ;;  %s140_s1 = int_to_ptr.vmem [resolvable:$true] %s139_s1 }
  0x1d   :  { %168 = vmatprep.subr.mxu0 %v278_v0  ;;  %v52_v9 = vld [vmem:[#allocation5 + $0x38] sm:$0xff]  ;;  %v51_v10 = vld [vmem:[#allocation5 + $0x30] sm:$0xff]  ;;  %v50_v11 = vld [vmem:[#allocation5 + $0x28] sm:$0xff]  ;;  %s248_s21 = scalar_lea.vmem %s140_s1, 128  ;;  %p253_p11 = scmp.lt.s32.totalorder %s140_s1, %s140_s1 }
  0x1e   :  { %169 = vmatpush3.msra.mxu0 %v59_v2  ;;  %v49_v12 = vld [vmem:[#allocation5 + $0x20] sm:$0xff]  ;;  %v48_v13 = vld [vmem:[#allocation5 + $0x18] sm:$0xff]  ;;  %v47_v14 = vld [vmem:[#allocation5 + $0x10] sm:$0xff]  ;;  %p249_p10 = scmp.ne.s32.totalorder %s140_s1, %s248_s21  ;;  %p254_p12 = scmp.lt.s32.totalorder %s248_s21, %s248_s21 }
  0x1f   :  { %170 = vmatprep.subr.mxu0 %v278_v0  ;;  %v46_v15 = vld [vmem:[#allocation5 + $0x8] sm:$0xff]  ;;  %v45_v16 = vld [vmem:[#allocation5] sm:$0xff]  ;;  %v44_v17 = vld [vmem:[#allocation2] sm:$0xff] }
  0x20   :  { %171 = vmatpush3.msra.mxu0 %v58_v3  ;;  %p255_p13 = por %p254_p12, %p253_p11 }
  0x21   :  { %172 = vmatprep.subr.mxu0 %v278_v0 }
  0x22   :  { %173 = vmatpush3.msra.mxu0 %v57_v4  ;;  %p256_p0 = pnand %p255_p13, %p249_p10 }
  0x23   :  { %174 = vmatprep.subr.mxu0 %v278_v0 }
  0x24   :  { %175 = vmatpush3.msra.mxu0 %v56_v5 }
  0x25   :  { %176 = vmatprep.subr.mxu0 %v278_v0 }
  0x26   :  { %177 = vmatpush3.msra.mxu0 %v55_v6 }
  0x27   :  { %178 = vmatprep.subr.mxu0 %v278_v0 }
  0x28   :  { %179 = vmatpush3.msra.mxu0 %v54_v7 }
  0x29   :  { %180 = vmatprep.subr.mxu0 %v278_v0 }
  0x2a   :  { %181 = vmatpush3.msra.mxu0 %v53_v8 }
  0x2b   :  { %182 = vmatprep.subr.mxu0 %v278_v0 }
  0x2c   :  { %183 = vmatpush3.msra.mxu0 %v52_v9 }
  0x2d   :  { %184 = vmatprep.subr.mxu0 %v278_v0 }
  0x2e   :  { %185 = vmatpush3.msra.mxu0 %v51_v10 }
  0x2f   :  { %186 = vmatprep.subr.mxu0 %v278_v0 }
  0x30   :  { %187 = vmatpush3.msra.mxu0 %v50_v11 }
  0x31   :  { %188 = vmatprep.subr.mxu0 %v278_v0 }
  0x32   :  { %189 = vmatpush3.msra.mxu0 %v49_v12 }
  0x33   :  { %190 = vmatprep.subr.mxu0 %v278_v0 }
  0x34   :  { %191 = vmatpush3.msra.mxu0 %v48_v13 }
  0x35   :  { %192 = vmatprep.subr.mxu0 %v278_v0 }
  0x36   :  { %193 = vmatpush3.msra.mxu0 %v47_v14 }
  0x37   :  { %194 = vmatprep.subr.mxu0 %v278_v0 }
  0x38   :  { %195 = vmatpush3.msra.mxu0 %v46_v15 }
  0x39   :  { %196 = vmatprep.subr.mxu0 %v278_v0 }
  0x3a   :  { %197 = vmatpush3.msra.mxu0 %v45_v16 }
  0x3b   :  { %199 = vmatmul.mubr.f32.vlgmr.msra.gmra.mxu0 %v44_v17 }
  0xfb   :  { %v127_v18 = vpop.f32.mrf.mxu0 }
  0xfc   :  { %132 = vst [vmem:[#allocation7] sm:$0xff] %v127_v18 }
  0xfd   :  { %v200_v19 = vpop.f32.mrf.mxu0 }
  0xfe   :  { %259 = shalt.err (!%p256_p0)
}
  0xff   :  { %142 = dma.vmem_to_hbm [thread:$0]  %s140_s1, 128, %s307_s2, [#allocation4]  }
 0x100   :  { %272 = dma.done.wait [#allocation4], 128  }
 0x101   :  { %273 = vsyncadd [#allocation4], 4294967168 }
 0x102   :  { %146 = vsyncpa [#allocation3], 1 }
 0x103   :  { %147 = vsyncpa [#allocation6], 1 }
 0x104   :  { %148 = vsyncpa [#allocation4], 1 }

</bundles_post_ra>
